<compile_context>
chip_gen: v7x
topology: tpu7x:2x2x1
jax: 0.10.0
libtpu: 0.0.40
codegen_flags: <defaults>
</compile_context>

<pallas_src>
import functools
import math

import jax
import jax.numpy as jnp
from jax.experimental import pallas as pl
from jax.experimental.pallas import tpu as pltpu


# --------------------------------------------------------------------------- #
# Kernels
# --------------------------------------------------------------------------- #
def _gate_math(z, state_f32, gate_w, out_dtype):
    """z: [bb, 4*gate_w] f32 pre-activations, column blocks = [r | i | n | hi]."""
    r = jax.nn.sigmoid(z[:, 0 * gate_w:1 * gate_w])
    i = jax.nn.sigmoid(z[:, 1 * gate_w:2 * gate_w])
    n = jnp.tanh(z[:, 2 * gate_w:3 * gate_w]
                 + r * z[:, 3 * gate_w:4 * gate_w])          # PyTorch quirk: reuse hi
    return ((1.0 - i) * n + i * state_f32).astype(out_dtype)


def _gru_kernel(h_ref, x_ref, wh_ref, wx_ref, b_ref, out_ref, *, gate_w):
    """state is None: state = hidden (f32, loaded once; bf16 cast only for MXU)."""
    h = h_ref[...]
    x = x_ref[...]
    mx_dt = wh_ref.dtype
    z = jnp.dot(h.astype(mx_dt), wh_ref[...], preferred_element_type=jnp.float32)
    z = z + jnp.dot(x.astype(mx_dt), wx_ref[...], preferred_element_type=jnp.float32)
    z = z + b_ref[...]                                        # bias is f32, VMEM-resident
    out_ref[...] = _gate_math(z, h.astype(jnp.float32), gate_w, out_ref.dtype)


def _gru_kernel_with_state(h_ref, x_ref, s_ref, wh_ref, wx_ref, b_ref, out_ref, *,
                           gate_w):
    """Explicit-state branch (state DMA'd in native dtype, cast in-kernel)."""
    h = h_ref[...]
    x = x_ref[...]
    mx_dt = wh_ref.dtype
    z = jnp.dot(h.astype(mx_dt), wh_ref[...], preferred_element_type=jnp.float32)
    z = z + jnp.dot(x.astype(mx_dt), wx_ref[...], preferred_element_type=jnp.float32)
    z = z + b_ref[...]
    out_ref[...] = _gate_math(z, s_ref[...].astype(jnp.float32), gate_w, out_ref.dtype)


# --------------------------------------------------------------------------- #
# Tiling heuristics
# --------------------------------------------------------------------------- #
def _pick_pack(B, n_hid):
    """Batch rows packed per lane-row so the output slab is ~128 lanes wide.

    Capped at 4 so the block-diagonal MXU inflation (x p) stays below the HBM
    roofline; reduced until it divides B (reshapes must stay free).
    """
    p = 128 // n_hid if n_hid <= 128 else 1
    p = max(1, min(p, 4))
    while p > 1 and B % p != 0:
        p -= 1
    return p


def _pick_block_rows(Bp, row_bytes):
    """Large tiles (amortize ~0.35us/step) but >= 2 grid steps when possible
    (v7x megacore), staying well inside the default scoped-VMEM budget."""
    if Bp <= 8:
        return Bp
    budget = 4 << 20                       # ~4 MiB of activation tiles per buffer set
    cap = max(8, budget // max(row_bytes, 1))
    for br in (4096, 2048, 1024, 512, 256, 128, 64, 32, 16, 8):
        if br <= cap and Bp % br == 0 and Bp // br >= 2:
            return br
    return Bp                              # ragged Bp: single full-extent tile


# --------------------------------------------------------------------------- #
# Wrapper
# --------------------------------------------------------------------------- #
def my_gru_forward(inputs, hidden, fused_params, state=None, *,
                   block_rows=None, out_dtype=None):
    """inputs: [B, n_in], hidden: [B, n_hid]. Returns [B, n_hid].

    fused_params = (Wh, Wx, b, p) from fuse_params(). Wh/Wx dtype (f32 or bf16)
    sets the MXU operand dtype; accumulation and gate math are always f32.
    """
    wh, wx, b, p = fused_params
    B, n_in = inputs.shape
    n_hid = hidden.shape[1]
    assert B % p == 0, "pack factor must divide the batch (pick it via _pick_pack)"
    Bp = B // p
    Hh, Hx, Hz = p * n_hid, p * n_in, 4 * p * n_hid
    assert wh.shape == (Hh, Hz) and wx.shape == (Hx, Hz) and b.shape == (1, Hz)

    if out_dtype is None:
        out_dtype = hidden.dtype
    out_dtype = jnp.dtype(out_dtype)

    # Free row-major reshapes (pure layout metadata, no HBM traffic): pack p
    # consecutive batch rows into one lane-dense row.
    h_packed = hidden.reshape(Bp, Hh)
    x_packed = inputs.reshape(Bp, Hx)

    row_bytes = (Hh * hidden.dtype.itemsize + Hx * inputs.dtype.itemsize
                 + Hh * out_dtype.itemsize)
    if state is not None:
        row_bytes += Hh * state.dtype.itemsize
    if block_rows is None:
        block_rows = _pick_block_rows(Bp, row_bytes)
    grid = (pl.cdiv(Bp, block_rows),)

    h_spec = pl.BlockSpec((block_rows, Hh), lambda i: (i, 0))
    x_spec = pl.BlockSpec((block_rows, Hx), lambda i: (i, 0))
    out_spec = pl.BlockSpec((block_rows, Hh), lambda i: (i, 0))
    # Constant index_map -> weights/bias stay VMEM-resident across grid steps.
    wh_spec = pl.BlockSpec(wh.shape, lambda i: (0, 0))
    wx_spec = pl.BlockSpec(wx.shape, lambda i: (0, 0))
    b_spec = pl.BlockSpec(b.shape, lambda i: (0, 0))

    cparams = pltpu.CompilerParams(dimension_semantics=("parallel",))
    out_shape = jax.ShapeDtypeStruct((Bp, Hh), out_dtype)

    if state is None:
        out_packed = pl.pallas_call(
            functools.partial(_gru_kernel, gate_w=Hh),
            out_shape=out_shape,
            grid=grid,
            in_specs=[h_spec, x_spec, wh_spec, wx_spec, b_spec],
            out_specs=out_spec,
            compiler_params=cparams,
        )(h_packed, x_packed, wh, wx, b)
    else:
        s_packed = state.reshape(Bp, Hh)            # native dtype, free reshape
        out_packed = pl.pallas_call(
            functools.partial(_gru_kernel_with_state, gate_w=Hh),
            out_shape=out_shape,
            grid=grid,
            in_specs=[h_spec, x_spec, h_spec, wh_spec, wx_spec, b_spec],
            out_specs=out_spec,
            compiler_params=cparams,
        )(h_packed, x_packed, s_packed, wh, wx, b)

    return out_packed.reshape(B, n_hid)             # free row-major reshape


# --------------------------------------------------------------------------- #
# Parameter construction
# --------------------------------------------------------------------------- #
def init_params(key, n_in_node, n_hid):
    """PyTorch nn.Linear-style uniform(-1/sqrt(fan_in), 1/sqrt(fan_in)) init.

    Weights pre-transposed to [in_features, out_features]; biases [1, n_hid].
    hidden_h exists in the module but is unused in forward, so it is omitted.
    """
    ks = jax.random.split(key, 8)

    def lin_w(k, fan_in, fan_out):
        bound = 1.0 / math.sqrt(fan_in)
        return jax.random.uniform(k, (fan_in, fan_out), jnp.float32, -bound, bound)

    def lin_b(k, fan_in, fan_out):
        bound = 1.0 / math.sqrt(fan_in)
        return jax.random.uniform(k, (1, fan_out), jnp.float32, -bound, bound)

    w_ir = lin_w(ks[0], n_in_node, n_hid); b_ir = lin_b(ks[1], n_in_node, n_hid)
    w_ii = lin_w(ks[2], n_in_node, n_hid); b_ii = lin_b(ks[3], n_in_node, n_hid)
    w_in = lin_w(ks[4], n_in_node, n_hid); b_in = lin_b(ks[5], n_in_node, n_hid)
    w_hr = lin_w(ks[6], n_hid, n_hid)      # hidden_r, bias=False
    w_hi = lin_w(ks[7], n_hid, n_hid)      # hidden_i, bias=False
    return (w_ir, b_ir, w_ii, b_ii, w_in, b_in, w_hr, w_hi)


def fuse_params(raw, dtype=jnp.bfloat16, pack=1):
    """Build split fused weights for the lane-dense packed layout.

    With p = pack batch rows per lane-row:
      Wh : [p*n_hid, 4*p*n_hid] = [bdiag(w_hr) | bdiag(w_hi) | 0 | bdiag(w_hi)]
      Wx : [p*n_in , 4*p*n_hid] = [bdiag(w_ir) | bdiag(w_ii) | bdiag(w_in) | 0]
      b  : [1, 4*p*n_hid] f32   = [tile(b_ir) | tile(b_ii) | tile(b_in) | 0]
    so z = h_packed @ Wh + x_packed @ Wx + b has gate column blocks
    [r | i | n | hi], each p*n_hid lanes wide with group j at lanes
    [j*n_hid : (j+1)*n_hid] inside its block.
    """
    (w_ir, b_ir, w_ii, b_ii, w_in, b_in, w_hr, w_hi) = raw
    n_in, n_hid = w_ir.shape
    p = pack

    def bdiag(w):
        k = w.shape[0]
        out = jnp.zeros((p * k, p * n_hid), jnp.float32)
        for j in range(p):
            out = out.at[j * k:(j + 1) * k, j * n_hid:(j + 1) * n_hid].set(w)
        return out

    wh = jnp.concatenate(
        [bdiag(w_hr), bdiag(w_hi),
         jnp.zeros((p * n_hid, p * n_hid), jnp.float32), bdiag(w_hi)],
        axis=1).astype(dtype)                                  # [p*n_hid, 4*p*n_hid]
    wx = jnp.concatenate(
        [bdiag(w_ir), bdiag(w_ii), bdiag(w_in),
         jnp.zeros((p * n_in, p * n_hid), jnp.float32)],
        axis=1).astype(dtype)                                  # [p*n_in, 4*p*n_hid]
    b = jnp.concatenate(
        [jnp.tile(b_ir, (1, p)), jnp.tile(b_ii, (1, p)), jnp.tile(b_in, (1, p)),
         jnp.zeros((1, p * n_hid), jnp.float32)],
        axis=1).astype(jnp.float32)                            # bias stays f32
    return wh, wx, b, p


# --------------------------------------------------------------------------- #
# Pure-JAX reference (mirrors the PyTorch forward, f32)
# --------------------------------------------------------------------------- #
def my_gru_reference(inputs, hidden, raw, state=None):
    if state is None:
        state = hidden
    (w_ir, b_ir, w_ii, b_ii, w_in, b_in, w_hr, w_hi) = raw
    hi = hidden @ w_hi
    r = jax.nn.sigmoid(inputs @ w_ir + b_ir + hidden @ w_hr)
    i = jax.nn.sigmoid(inputs @ w_ii + b_ii + hi)
    n = jnp.tanh(inputs @ w_in + b_in + r * hi)
    return (1.0 - i) * n + i * state


if __name__ == "__main__":
    n_in_node, n_hid = 16, 32
    key = jax.random.PRNGKey(0)
    k_x, k_h, k_p, k_s = jax.random.split(key, 4)
    raw = init_params(k_p, n_in_node, n_hid)

    for B in (8, 128):                      # B=128 exercises a multi-step grid
        x = jax.random.normal(jax.random.fold_in(k_x, B), (B, n_in_node), jnp.float32)
        h = jax.random.normal(jax.random.fold_in(k_h, B), (B, n_hid), jnp.float32)
        ref = my_gru_reference(x, h, raw)

        p = _pick_pack(B, n_hid)            # 4 -> 128-lane-dense output

        # f32 fused-matmul path (tight numerical check).
        params_f32 = fuse_params(raw, dtype=jnp.float32, pack=p)
        out_f32 = jax.block_until_ready(my_gru_forward(x, h, params_f32))
        assert out_f32.shape == (B, n_hid)
        assert jnp.allclose(out_f32, ref, atol=1e-5, rtol=1e-5), "f32 kernel mismatch"

        # bf16 operand path (perf path: bf16 weights + bf16 MXU operands,
        # f32 accumulation, f32 state blend, f32 bias).
        params_bf16 = fuse_params(raw, dtype=jnp.bfloat16, pack=p)
        out_bf16 = jax.block_until_ready(my_gru_forward(x, h, params_bf16))
        assert jnp.allclose(out_bf16, ref, atol=2e-2, rtol=2e-2), "bf16 kernel mismatch"

        # Explicit-state branch (state DMA'd in native dtype).
        s = jax.random.normal(jax.random.fold_in(k_s, B), (B, n_hid), jnp.float32)
        out_s = jax.block_until_ready(my_gru_forward(x, h, params_f32, state=s))
        ref_s = my_gru_reference(x, h, raw, state=s)
        assert jnp.allclose(out_s, ref_s, atol=1e-5, rtol=1e-5), "explicit-state mismatch"

    print("KERNEL_OK")
</pallas_src>

<mosaic_0001>
module attributes {stable_mosaic.version = 11 : i64} {
  func.func @_gru_kernel(%arg0: i32, %arg1: memref<2x128xf32, #tpu.memory_space<vmem>>, %arg2: memref<2x64xf32, #tpu.memory_space<vmem>>, %arg3: memref<128x512xf32, #tpu.memory_space<vmem>>, %arg4: memref<64x512xf32, #tpu.memory_space<vmem>>, %arg5: memref<1x512xf32, #tpu.memory_space<vmem>>, %arg6: memref<2x128xf32, #tpu.memory_space<vmem>>) attributes {dimension_semantics = [#tpu.dimension_semantics<parallel>], iteration_bounds = array<i64: 1>, scalar_prefetch = 0 : i64, scratch_operands = 0 : i64, tpu.core_type = #tpu.core_type<tc>, window_params = [{transform_indices = @transform_0, window_bounds = array<i64: 2, 128>}, {transform_indices = @transform_1, window_bounds = array<i64: 2, 64>}, {pipeline_mode = #tpu.pipeline_mode<synchronous>, transform_indices = @transform_2, window_bounds = array<i64: 128, 512>}, {pipeline_mode = #tpu.pipeline_mode<synchronous>, transform_indices = @transform_3, window_bounds = array<i64: 64, 512>}, {pipeline_mode = #tpu.pipeline_mode<synchronous>, transform_indices = @transform_4, window_bounds = array<i64: 1, 512>}, {transform_indices = @transform_5, window_bounds = array<i64: 2, 128>}]} {
    %c0 = arith.constant 0 : index
    %c0_0 = arith.constant 0 : index
    %0 = vector.load %arg1[%c0, %c0_0] : memref<2x128xf32, #tpu.memory_space<vmem>>, vector<2x128xf32>
    %c0_1 = arith.constant 0 : index
    %c0_2 = arith.constant 0 : index
    %1 = vector.load %arg2[%c0_1, %c0_2] : memref<2x64xf32, #tpu.memory_space<vmem>>, vector<2x64xf32>
    %c0_3 = arith.constant 0 : index
    %c0_4 = arith.constant 0 : index
    %2 = vector.load %arg3[%c0_3, %c0_4] : memref<128x512xf32, #tpu.memory_space<vmem>>, vector<128x512xf32>
    %cst = arith.constant dense<0.000000e+00> : vector<2x512xf32>
    %3 = tpu.matmul %0, %2, %cst {dimension_numbers = #tpu.dot_dimension_numbers<[1], [0], [0], [1], [0, 0, 1, 1], [], []>} : vector<2x128xf32>, vector<128x512xf32>, vector<2x512xf32> -> vector<2x512xf32>
    %c0_5 = arith.constant 0 : index
    %c0_6 = arith.constant 0 : index
    %4 = vector.load %arg4[%c0_5, %c0_6] : memref<64x512xf32, #tpu.memory_space<vmem>>, vector<64x512xf32>
    %cst_7 = arith.constant dense<0.000000e+00> : vector<2x512xf32>
    %5 = tpu.matmul %1, %4, %cst_7 {dimension_numbers = #tpu.dot_dimension_numbers<[1], [0], [0], [1], [0, 0, 1, 1], [], []>} : vector<2x64xf32>, vector<64x512xf32>, vector<2x512xf32> -> vector<2x512xf32>
    %6 = arith.addf %3, %5 : vector<2x512xf32>
    %c0_8 = arith.constant 0 : index
    %c0_9 = arith.constant 0 : index
    %7 = vector.load %arg5[%c0_8, %c0_9] : memref<1x512xf32, #tpu.memory_space<vmem>>, vector<1x512xf32>
    %8 = vector.broadcast %7 : vector<1x512xf32> to vector<2x512xf32>
    %9 = arith.addf %6, %8 : vector<2x512xf32>
    %10 = vector.extract_strided_slice %9 {offsets = [0, 0], sizes = [2, 128], strides = [1, 1]} : vector<2x512xf32> to vector<2x128xf32>
    %11 = arith.negf %10 : vector<2x128xf32>
    %12 = math.exp %11 : vector<2x128xf32>
    %cst_10 = arith.constant 1.000000e+00 : f32
    %13 = vector.broadcast %cst_10 : f32 to vector<2x128xf32>
    %14 = arith.addf %13, %12 : vector<2x128xf32>
    %15 = arith.divf %13, %14 : vector<2x128xf32>
    %16 = vector.extract_strided_slice %9 {offsets = [0, 128], sizes = [2, 128], strides = [1, 1]} : vector<2x512xf32> to vector<2x128xf32>
    %17 = arith.negf %16 : vector<2x128xf32>
    %18 = math.exp %17 : vector<2x128xf32>
    %cst_11 = arith.constant 1.000000e+00 : f32
    %19 = vector.broadcast %cst_11 : f32 to vector<2x128xf32>
    %20 = arith.addf %19, %18 : vector<2x128xf32>
    %21 = arith.divf %19, %20 : vector<2x128xf32>
    %22 = vector.extract_strided_slice %9 {offsets = [0, 256], sizes = [2, 128], strides = [1, 1]} : vector<2x512xf32> to vector<2x128xf32>
    %23 = vector.extract_strided_slice %9 {offsets = [0, 384], sizes = [2, 128], strides = [1, 1]} : vector<2x512xf32> to vector<2x128xf32>
    %24 = arith.mulf %15, %23 : vector<2x128xf32>
    %25 = arith.addf %22, %24 : vector<2x128xf32>
    %26 = math.tanh %25 : vector<2x128xf32>
    %cst_12 = arith.constant 1.000000e+00 : f32
    %27 = vector.broadcast %cst_12 : f32 to vector<2x128xf32>
    %28 = arith.subf %27, %21 : vector<2x128xf32>
    %29 = arith.mulf %28, %26 : vector<2x128xf32>
    %30 = arith.mulf %21, %0 : vector<2x128xf32>
    %31 = arith.addf %29, %30 : vector<2x128xf32>
    %c0_13 = arith.constant 0 : index
    %c0_14 = arith.constant 0 : index
    %32 = vector.load %arg6[%c0_13, %c0_14] : memref<2x128xf32, #tpu.memory_space<vmem>>, vector<2x128xf32>
    tpu.vector_store %arg6[%c0_13, %c0_14], %31 {strides = array<i32>} : memref<2x128xf32, #tpu.memory_space<vmem>>, vector<2x128xf32>,
    return
  }
  func.func @transform_0(%arg0: i32) -> (i32, i32) {
    %c0_i32 = arith.constant 0 : i32
    %c0_i32_0 = arith.constant 0 : i32
    return %arg0, %c0_i32 : i32, i32
  }
  func.func @transform_1(%arg0: i32) -> (i32, i32) {
    %c0_i32 = arith.constant 0 : i32
    %c0_i32_0 = arith.constant 0 : i32
    return %arg0, %c0_i32 : i32, i32
  }
  func.func @transform_2(%arg0: i32) -> (i32, i32) {
    %c0_i32 = arith.constant 0 : i32
    %c0_i32_0 = arith.constant 0 : i32
    %c0_i32_1 = arith.constant 0 : i32
    return %c0_i32, %c0_i32_0 : i32, i32
  }
  func.func @transform_3(%arg0: i32) -> (i32, i32) {
    %c0_i32 = arith.constant 0 : i32
    %c0_i32_0 = arith.constant 0 : i32
    %c0_i32_1 = arith.constant 0 : i32
    return %c0_i32, %c0_i32_0 : i32, i32
  }
  func.func @transform_4(%arg0: i32) -> (i32, i32) {
    %c0_i32 = arith.constant 0 : i32
    %c0_i32_0 = arith.constant 0 : i32
    %c0_i32_1 = arith.constant 0 : i32
    return %c0_i32, %c0_i32_0 : i32, i32
  }
  func.func @transform_5(%arg0: i32) -> (i32, i32) {
    %c0_i32 = arith.constant 0 : i32
    %c0_i32_0 = arith.constant 0 : i32
    return %arg0, %c0_i32 : i32, i32
  }
}

</mosaic_0001>

<bundles_post_ra>
// kernel: tpu_custom_call.1
= control target key start
LH: loop header
LB: loop body
LE: loop exit
PB: predicated region body
PF: predicated region fallthrough
CT: control target
= control target key end

     0   :  { %10 = vsyncpa [#allocation3], 0  ;;  %s826_s0 = inlined_call_operand.hbm [shape: f32[2,128], index: 0, kind: input, shape index: {}]   ;;  %s827_s1 = inlined_call_operand.vmem [shape: f32[2,64], index: 1, kind: input, shape index: {}]   ;;  %s828_s2 = inlined_call_operand.hbm [shape: f32[128,512], index: 2, kind: input, shape index: {}]   ;;  %s829_s3 = inlined_call_operand.hbm [shape: f32[64,512], index: 3, kind: input, shape index: {}]   ;;  %s830_s4 = inlined_call_operand.vmem [shape: f32[1,512], index: 4, kind: input, shape index: {}]   ;;  %s831_s5 = inlined_call_operand.hbm [shape: f32[2,128], index: 5, kind: output, shape index: {}]  }
   0x1   :  { %11 = vsyncpa [#allocation6], 0 }
   0x2   :  { %12 = vsyncpa [#allocation4], 0  ;;  %s723_s18 = smov [#allocation5]   ;;  %s629_s22 = scalar_lea.hbm %s828_s2, 8192 }
   0x3   :  { %s30_s19 = sshll.u32 %s723_s18, 4  ;;  %p630_p0 = scmp.ne.s32.totalorder %s828_s2, %s629_s22  ;;  %s31_s19 = int_to_ptr.vmem [resolvable:$true] %s30_s19 }
   0x4   :  { %p633_p1 = scmp.lt.u32.totalorder %s629_s22, %s828_s2 }
   0x6   :  { %p635_p2 = pnand %p633_p1, %p630_p0 }
   0x8   :  { %638 = shalt.err (!%p635_p2)
}
   0x9   :  { %s639_s27 = scalar_lea.vmem %s31_s19, 8192  ;;  %p644_p4 = scmp.lt.s32.totalorder %s31_s19, %s31_s19 }
   0xa   :  { %p640_p3 = scmp.ne.s32.totalorder %s31_s19, %s639_s27  ;;  %p645_p5 = scmp.lt.s32.totalorder %s639_s27, %s639_s27 }
   0xc   :  { %p646_p6 = por %p645_p5, %p644_p4 }
   0xe   :  { %p647_p7 = pnand %p646_p6, %p640_p3 }
  0x10   :  { %650 = shalt.err (!%p647_p7)
}
  0x11   :  { %s724_s28 = smov 512   ;;  %s725_s29 = smov 32  }
  0x12   :  { %36 = dma.hbm_to_vmem [thread:$0]  %s828_s2, 8192, %s31_s19, [#allocation6], %s724_s28, %s724_s28, %s725_s29  }
  0x13   :  { %s726_s7 = smov [#allocation2]   ;;  %s727_s9 = smov [#allocation7]  }
  0x14   :  { %s19_s8 = sshll.u32 %s726_s7, 4  ;;  %s42_s10 = sshll.u32 %s727_s9, 4  ;;  %s20_s8 = int_to_ptr.vmem [resolvable:$true] %s19_s8  ;;  %s43_s10 = int_to_ptr.vmem [resolvable:$true] %s42_s10 }
  0x15   :  { %s651_s13 = scalar_lea.hbm %s826_s0, 32 }
  0x16   :  { %p652_p8 = scmp.ne.s32.totalorder %s826_s0, %s651_s13  ;;  %p655_p9 = scmp.lt.u32.totalorder %s651_s13, %s826_s0 }
  0x18   :  { %p657_p10 = pnand %p655_p9, %p652_p8 }
  0x1a   :  { %660 = shalt.err (!%p657_p10)
}
  0x1b   :  { %s661_s2 = scalar_lea.vmem %s20_s8, 32  ;;  %p666_p12 = scmp.lt.s32.totalorder %s20_s8, %s20_s8 }
  0x1c   :  { %p662_p11 = scmp.ne.s32.totalorder %s20_s8, %s661_s2  ;;  %p667_p13 = scmp.lt.s32.totalorder %s661_s2, %s661_s2 }
  0x1e   :  { %p668_p0 = por %p667_p13, %p666_p12 }
  0x20   :  { %p669_p1 = pnand %p668_p0, %p662_p11 }
  0x22   :  { %672 = shalt.err (!%p669_p1)
}
  0x23   :  { %22 = dma.hbm_to_vmem [thread:$0]  %s826_s0, 32, %s20_s8, [#allocation3]  }
  0x24   :  { %s673_s22 = scalar_lea.hbm %s829_s3, 4096 }
  0x25   :  { %p674_p2 = scmp.ne.s32.totalorder %s829_s3, %s673_s22  ;;  %p677_p3 = scmp.lt.u32.totalorder %s673_s22, %s829_s3 }
  0x27   :  { %p679_p4 = pnand %p677_p3, %p674_p2 }
  0x29   :  { %682 = shalt.err (!%p679_p4)
}
  0x2a   :  { %s683_s27 = scalar_lea.vmem %s43_s10, 4096  ;;  %p688_p6 = scmp.lt.s32.totalorder %s43_s10, %s43_s10 }
  0x2b   :  { %p684_p5 = scmp.ne.s32.totalorder %s43_s10, %s683_s27  ;;  %p689_p7 = scmp.lt.s32.totalorder %s683_s27, %s683_s27 }
  0x2d   :  { %p690_p8 = por %p689_p7, %p688_p6 }
  0x2f   :  { %p691_p9 = pnand %p690_p8, %p684_p5 }
  0x31   :  { %694 = shalt.err (!%p691_p9)
}
  0x32   :  { %48 = dma.hbm_to_vmem [thread:$0]  %s829_s3, 4096, %s43_s10, [#allocation6], %s724_s28, %s724_s28, %s725_s29  }
  0x33   :  { %717 = dma.done.wait [#allocation3], 32  }
  0x34   :  { %718 = vsyncadd [#allocation3], 4294967264 }
  0x35   :  { %719 = dma.done.wait [#allocation6], 12288  }
  0x36   :  { %720 = vsyncadd [#allocation6], 4294955008  ;;  %v728_v0 = vmov 0.0   ;;  %v127_v1 = vld [vmem:[#allocation7 + $0x8] sm:$0xff]  ;;  %v129_v3 = vld [vmem:[#allocation7 + $0x18] sm:$0xff]  ;;  %vm158_vm0 = vcmask 523264  }
  0x37   :  { %226 = vmatprep.mubr.f32.mxu0 %v728_v0  ;;  %297 = vmatprep.mubr.f32.mxu1 %v728_v0  ;;  %v131_v2 = vld [vmem:[#allocation7 + $0x28] sm:$0xff]  ;;  %v133_v5 = vld [vmem:[#allocation7 + $0x38] sm:$0xff]  ;;  %v126_v6 = vld [vmem:[#allocation7] sm:$0xff] }
  0x38   :  { %v512_v4 = vpack.c.bf16 %v131_v2, %v127_v1  ;;  %v130_v7 = vld [vmem:[#allocation7 + $0x20] sm:$0xff]  ;;  %v528_v8 = vpack.c.bf16 %v133_v5, %v129_v3  ;;  %v128_v10 = vld [vmem:[#allocation7 + $0x10] sm:$0xff]  ;;  %v135_v12 = vld [vmem:[#allocation7 + $0x48] sm:$0xff] }
  0x39   :  { %v514_v9 = vpack.c.bf16 %v130_v7, %v126_v6  ;;  %v132_v11 = vld [vmem:[#allocation7 + $0x30] sm:$0xff]  ;;  %v139_v14 = vld [vmem:[#allocation7 + $0x68] sm:$0xff]  ;;  %v137_v15 = vld [vmem:[#allocation7 + $0x58] sm:$0xff] }
  0x3a   :  { %513 = vmatprep.subr.bf16.mxu0 %v512_v4  ;;  %v530_v13 = vpack.c.bf16 %v132_v11, %v128_v10  ;;  %v141_v16 = vld [vmem:[#allocation7 + $0x78] sm:$0xff]  ;;  %529 = vmatprep.subr.bf16.mxu1 %v528_v8  ;;  %v516_v17 = vpack.c.bf16 %v139_v14, %v135_v12  ;;  %v134_v19 = vld [vmem:[#allocation7 + $0x40] sm:$0xff]  ;;  %v136_v21 = vld [vmem:[#allocation7 + $0x50] sm:$0xff] }
  0x3b   :  { %515 = vmatpush1.bf16.msra.mxu0 %v514_v9  ;;  %v532_v18 = vpack.c.bf16 %v141_v16, %v137_v15  ;;  %v138_v20 = vld [vmem:[#allocation7 + $0x60] sm:$0xff]  ;;  %v140_v23 = vld [vmem:[#allocation7 + $0x70] sm:$0xff]  ;;  %v143_v24 = vld [vmem:[#allocation7 + $0x88] sm:$0xff] }
  0x3c   :  { %531 = vmatpush1.bf16.msra.mxu1 %v530_v13  ;;  %v518_v22 = vpack.c.bf16 %v138_v20, %v134_v19  ;;  %v147_v25 = vld [vmem:[#allocation7 + $0xa8] sm:$0xff]  ;;  %517 = vmatprep.subr.bf16.mxu0 %v516_v17  ;;  %v534_v26 = vpack.c.bf16 %v140_v23, %v136_v21  ;;  %v145_v28 = vld [vmem:[#allocation7 + $0x98] sm:$0xff]  ;;  %v142_v30 = vld [vmem:[#allocation7 + $0x80] sm:$0xff] }
  0x3d   :  { %533 = vmatprep.subr.bf16.mxu1 %v532_v18  ;;  %v520_v27 = vpack.c.bf16 %v147_v25, %v143_v24  ;;  %v149_v29 = vld [vmem:[#allocation7 + $0xb8] sm:$0xff]  ;;  %v146_v32 = vld [vmem:[#allocation7 + $0xa0] sm:$0xff]  ;;  %v144_v33 = vld [vmem:[#allocation7 + $0x90] sm:$0xff] }
  0x3e   :  { %v536_v31 = vpack.c.bf16 %v149_v29, %v145_v28  ;;  %v148_v34 = vld [vmem:[#allocation7 + $0xb0] sm:$0xff]  ;;  %v522_v35 = vpack.c.bf16 %v146_v32, %v142_v30  ;;  %v151_v36 = vld [vmem:[#allocation7 + $0xc8] sm:$0xff]  ;;  %v153_v38 = vld [vmem:[#allocation7 + $0xd8] sm:$0xff] }
  0x3f   :  { %519 = vmatpush1.bf16.msra.mxu0 %v518_v22  ;;  %v155_v37 = vld [vmem:[#allocation7 + $0xe8] sm:$0xff]  ;;  %v538_v39 = vpack.c.bf16 %v148_v34, %v144_v33  ;;  %v157_v41 = vld [vmem:[#allocation7 + $0xf8] sm:$0xff]  ;;  %v150_v42 = vld [vmem:[#allocation7 + $0xc0] sm:$0xff] }
  0x40   :  { %535 = vmatpush1.bf16.msra.mxu1 %v534_v26  ;;  %521 = vmatprep.subr.bf16.mxu0 %v520_v27  ;;  %v524_v40 = vpack.c.bf16 %v155_v37, %v151_v36  ;;  %v154_v43 = vld [vmem:[#allocation7 + $0xe0] sm:$0xff]  ;;  %v540_v44 = vpack.c.bf16 %v157_v41, %v153_v38  ;;  %v152_v45 = vld [vmem:[#allocation7 + $0xd0] sm:$0xff]  ;;  %v63_v47 = vld [vmem:[#allocation5 + $0x8] sm:$0xff] }
  0x41   :  { %537 = vmatprep.subr.bf16.mxu1 %v536_v31  ;;  %v156_v46 = vld [vmem:[#allocation7 + $0xf0] sm:$0xff]  ;;  %v67_v48 = vld [vmem:[#allocation5 + $0x28] sm:$0xff]  ;;  %v65_v49 = vld [vmem:[#allocation5 + $0x18] sm:$0xff]  ;;  %v526_v51 = vpack.c.bf16 %v154_v43, %v150_v42 }
  0x42   :  { %v69_v50 = vld [vmem:[#allocation5 + $0x38] sm:$0xff]  ;;  %v542_v52 = vpack.c.bf16 %v156_v46, %v152_v45  ;;  %v544_v53 = vpack.c.bf16 %v67_v48, %v63_v47  ;;  %v62_v54 = vld [vmem:[#allocation5] sm:$0xff]  ;;  %v64_v56 = vld [vmem:[#allocation5 + $0x10] sm:$0xff] }
  0x43   :  { %523 = vmatpush1.bf16.msra.mxu0 %v522_v35  ;;  %v66_v55 = vld [vmem:[#allocation5 + $0x20] sm:$0xff]  ;;  %v576_v57 = vpack.c.bf16 %v69_v50, %v65_v49  ;;  %v68_v58 = vld [vmem:[#allocation5 + $0x30] sm:$0xff]  ;;  %v71_v59 = vld [vmem:[#allocation5 + $0x48] sm:$0xff] }
  0x44   :  { %539 = vmatpush1.bf16.msra.mxu1 %v538_v39  ;;  %525 = vmatprep.subr.bf16.mxu0 %v524_v40  ;;  %v75_v60 = vld [vmem:[#allocation5 + $0x68] sm:$0xff]  ;;  %v73_v61 = vld [vmem:[#allocation5 + $0x58] sm:$0xff]  ;;  %v61_v63 = vld [vmem:[%s827_s1] sm:$0x3]  ;;  %v546_v1 = vpack.c.bf16 %v66_v55, %v62_v54  ;;  %v578_v2 = vpack.c.bf16 %v68_v58, %v64_v56 }
  0x45   :  { %541 = vmatprep.subr.bf16.mxu1 %v540_v44  ;;  %v77_v62 = vld [vmem:[#allocation5 + $0x78] sm:$0xff]  ;;  %v548_v3 = vpack.c.bf16 %v75_v60, %v71_v59  ;;  %v70_v4 = vld [vmem:[#allocation5 + $0x40] sm:$0xff]  ;;  %v72_v6 = vld [vmem:[#allocation5 + $0x50] sm:$0xff] }
  0x46   :  { %v74_v5 = vld [vmem:[#allocation5 + $0x60] sm:$0xff]  ;;  %v580_v7 = vpack.c.bf16 %v77_v62, %v73_v61  ;;  %v76_v8 = vld [vmem:[#allocation5 + $0x70] sm:$0xff]  ;;  %v79_v9 = vld [vmem:[#allocation5 + $0x88] sm:$0xff] }
  0x47   :  { %527 = vmatpush1.bf16.msra.mxu0 %v526_v51  ;;  %v83_v10 = vld [vmem:[#allocation5 + $0xa8] sm:$0xff]  ;;  %v81_v11 = vld [vmem:[#allocation5 + $0x98] sm:$0xff]  ;;  %v550_v13 = vpack.c.bf16 %v74_v5, %v70_v4  ;;  %v582_v14 = vpack.c.bf16 %v76_v8, %v72_v6  ;;  %v78_v16 = vld [vmem:[#allocation5 + $0x80] sm:$0xff] }
  0x48   :  { %543 = vmatpush1.bf16.msra.mxu1 %v542_v52  ;;  %545 = vmatprep.subr.bf16.mxu0 %v544_v53  ;;  %v85_v12 = vld [vmem:[#allocation5 + $0xb8] sm:$0xff]  ;;  %v552_v15 = vpack.c.bf16 %v83_v10, %v79_v9  ;;  %v82_v17 = vld [vmem:[#allocation5 + $0xa0] sm:$0xff]  ;;  %v80_v18 = vld [vmem:[#allocation5 + $0x90] sm:$0xff] }
  0x49   :  { %577 = vmatprep.subr.bf16.mxu1 %v576_v57  ;;  %v584_v19 = vpack.c.bf16 %v85_v12, %v81_v11  ;;  %v84_v20 = vld [vmem:[#allocation5 + $0xb0] sm:$0xff]  ;;  %v87_v21 = vld [vmem:[#allocation5 + $0xc8] sm:$0xff]  ;;  %v89_v23 = vld [vmem:[#allocation5 + $0xd8] sm:$0xff]  ;;  %v554_v25 = vpack.c.bf16 %v82_v17, %v78_v16 }
  0x4a   :  { %508 = vmatmul.mubr.msk.f32.vlgmr.msra.gmra.mrb[0].mxu0 %vm158_vm0, %v61_v63  ;;  %v91_v22 = vld [vmem:[#allocation5 + $0xe8] sm:$0xff]  ;;  %v93_v24 = vld [vmem:[#allocation5 + $0xf8] sm:$0xff]  ;;  %v586_v26 = vpack.c.bf16 %v84_v20, %v80_v18  ;;  %v86_v28 = vld [vmem:[#allocation5 + $0xc0] sm:$0xff]  ;;  %v448_v20 = vlaneseq }
  0x4b   :  { %509 = vmatmul.mubr.msk.f32.vlgmr.msra.gmra.mrb[0].mxu1 %vm158_vm0, %v61_v63  ;;  %547 = vmatpush1.bf16.msra.mxu0 %v546_v1  ;;  %v556_v27 = vpack.c.bf16 %v91_v22, %v87_v21  ;;  %v90_v29 = vld [vmem:[#allocation5 + $0xe0] sm:$0xff]  ;;  %v88_v30 = vld [vmem:[#allocation5 + $0xd0] sm:$0xff]  ;;  %v588_v31 = vpack.c.bf16 %v93_v24, %v89_v23  ;;  %v95_v33 = vld [vmem:[#allocation5 + $0x108] sm:$0xff] }
  0x4c   :  { %579 = vmatpush1.bf16.msra.mxu1 %v578_v2  ;;  %549 = vmatprep.subr.bf16.mxu0 %v548_v3  ;;  %v92_v32 = vld [vmem:[#allocation5 + $0xf0] sm:$0xff]  ;;  %v99_v34 = vld [vmem:[#allocation5 + $0x128] sm:$0xff]  ;;  %v97_v35 = vld [vmem:[#allocation5 + $0x118] sm:$0xff]  ;;  %v558_v37 = vpack.c.bf16 %v90_v29, %v86_v28  ;;  %v449_v21 = vshrl.u32 %v448_v20, 7 }
  0x4d   :  { %581 = vmatprep.subr.bf16.mxu1 %v580_v7  ;;  %368 = vmatprep.mubr.f32.mxu0 %v728_v0  ;;  %v101_v36 = vld [vmem:[#allocation5 + $0x138] sm:$0xff]  ;;  %v560_v38 = vpack.c.bf16 %v99_v34, %v95_v33  ;;  %v94_v39 = vld [vmem:[#allocation5 + $0x100] sm:$0xff]  ;;  %v96_v41 = vld [vmem:[#allocation5 + $0x110] sm:$0xff] }
  0x4e   :  { %439 = vmatprep.mubr.f32.mxu1 %v728_v0  ;;  %v590_v0 = vpack.c.bf16 %v92_v32, %v88_v30  ;;  %v98_v40 = vld [vmem:[#allocation5 + $0x120] sm:$0xff]  ;;  %v592_v42 = vpack.c.bf16 %v101_v36, %v97_v35  ;;  %v100_v43 = vld [vmem:[#allocation5 + $0x130] sm:$0xff]  ;;  %v103_v44 = vld [vmem:[#allocation5 + $0x148] sm:$0xff]  ;;  %v450_v22 = vsub.s32 0, %v449_v21  ;;  %v454_v24 = vsub.s32 1, %v449_v21 }
  0x4f   :  { %551 = vmatpush1.bf16.msra.mxu0 %v550_v13  ;;  %v107_v45 = vld [vmem:[#allocation5 + $0x168] sm:$0xff]  ;;  %v105_v46 = vld [vmem:[#allocation5 + $0x158] sm:$0xff]  ;;  %v562_v48 = vpack.c.bf16 %v98_v40, %v94_v39  ;;  %v594_v49 = vpack.c.bf16 %v100_v43, %v96_v41  ;;  %v102_v51 = vld [vmem:[#allocation5 + $0x140] sm:$0xff] }
  0x50   :  { %583 = vmatpush1.bf16.msra.mxu1 %v582_v14  ;;  %553 = vmatprep.subr.bf16.mxu0 %v552_v15  ;;  %v109_v47 = vld [vmem:[#allocation5 + $0x178] sm:$0xff]  ;;  %v564_v50 = vpack.c.bf16 %v107_v45, %v103_v44  ;;  %v106_v52 = vld [vmem:[#allocation5 + $0x160] sm:$0xff]  ;;  %v104_v53 = vld [vmem:[#allocation5 + $0x150] sm:$0xff] }
  0x51   :  { %585 = vmatprep.subr.bf16.mxu1 %v584_v19  ;;  %v596_v54 = vpack.c.bf16 %v109_v47, %v105_v46  ;;  %v108_v55 = vld [vmem:[#allocation5 + $0x170] sm:$0xff]  ;;  %v111_v56 = vld [vmem:[#allocation5 + $0x188] sm:$0xff]  ;;  %v113_v58 = vld [vmem:[#allocation5 + $0x198] sm:$0xff]  ;;  %v566_v60 = vpack.c.bf16 %v106_v52, %v102_v51 }
  0x52   :  { %v115_v57 = vld [vmem:[#allocation5 + $0x1a8] sm:$0xff]  ;;  %v117_v59 = vld [vmem:[#allocation5 + $0x1b8] sm:$0xff]  ;;  %v598_v61 = vpack.c.bf16 %v108_v55, %v104_v53  ;;  %v110_v63 = vld [vmem:[#allocation5 + $0x180] sm:$0xff] }
  0x53   :  { %555 = vmatpush1.bf16.msra.mxu0 %v554_v25  ;;  %v568_v62 = vpack.c.bf16 %v115_v57, %v111_v56  ;;  %v114_v1 = vld [vmem:[#allocation5 + $0x1a0] sm:$0xff]  ;;  %v112_v2 = vld [vmem:[#allocation5 + $0x190] sm:$0xff]  ;;  %v600_v3 = vpack.c.bf16 %v117_v59, %v113_v58  ;;  %v119_v5 = vld [vmem:[#allocation5 + $0x1c8] sm:$0xff] }
  0x54   :  { %587 = vmatpush1.bf16.msra.mxu1 %v586_v26  ;;  %557 = vmatprep.subr.bf16.mxu0 %v556_v27  ;;  %v116_v4 = vld [vmem:[#allocation5 + $0x1b0] sm:$0xff]  ;;  %v123_v6 = vld [vmem:[#allocation5 + $0x1e8] sm:$0xff]  ;;  %v121_v7 = vld [vmem:[#allocation5 + $0x1d8] sm:$0xff]  ;;  %v570_v9 = vpack.c.bf16 %v114_v1, %v110_v63 }
  0x55   :  { %589 = vmatprep.subr.bf16.mxu1 %v588_v31  ;;  %v125_v8 = vld [vmem:[#allocation5 + $0x1f8] sm:$0xff]  ;;  %v602_v10 = vpack.c.bf16 %v116_v4, %v112_v2  ;;  %v572_v11 = vpack.c.bf16 %v123_v6, %v119_v5  ;;  %v118_v12 = vld [vmem:[#allocation5 + $0x1c0] sm:$0xff]  ;;  %v120_v15 = vld [vmem:[#allocation5 + $0x1d0] sm:$0xff] }
  0x56   :  { %v122_v13 = vld [vmem:[#allocation5 + $0x1e0] sm:$0xff]  ;;  %v604_v14 = vpack.c.bf16 %v125_v8, %v121_v7  ;;  %v124_v16 = vld [vmem:[#allocation5 + $0x1f0] sm:$0xff]  ;;  %v60_v19 = vld [vmem:[#allocation2] sm:$0x3] }
  0x57   :  { %559 = vmatpush1.bf16.msra.mxu0 %v558_v37  ;;  %v574_v17 = vpack.c.bf16 %v122_v13, %v118_v12  ;;  %v606_v18 = vpack.c.bf16 %v124_v16, %v120_v15  ;;  %v446_v23 = vld [vmem:[%s830_s4] sm:$0xf]  ;;  %v462_v37 = vsub.s32 3, %v449_v21  ;;  %s729_s4 = smov [#allocation8]  }
  0x58   :  { %591 = vmatpush1.bf16.msra.mxu1 %v590_v0  ;;  %561 = vmatprep.subr.bf16.mxu0 %v560_v38  ;;  %v451_v25 = vrot.slane %v446_v23, %v450_v22  ;;  %v455_v27 = vrot.slane %v446_v23, %v454_v24  ;;  %v458_v0 = vsub.s32 2, %v449_v21  ;;  %s498_s6 = sshll.u32 %s729_s4, 4  ;;  %s499_s6 = int_to_ptr.vmem [resolvable:$true] %s498_s6 }
  0x59   :  { %593 = vmatprep.subr.bf16.mxu1 %v592_v42  ;;  %v463_v39 = vrot.slane %v446_v23, %v462_v37  ;;  %s695_s7 = scalar_lea.vmem %s499_s6, 32  ;;  %p700_p11 = scmp.lt.s32.totalorder %s499_s6, %s499_s6 }
  0x5a   :  { %v459_v40 = vrot.slane %v446_v23, %v458_v0  ;;  %p696_p10 = scmp.ne.s32.totalorder %s499_s6, %s695_s7  ;;  %p701_p12 = scmp.lt.s32.totalorder %s695_s7, %s695_s7 }
  0x5b   :  { %563 = vmatpush1.bf16.msra.mxu0 %v562_v48 }
  0x5c   :  { %595 = vmatpush1.bf16.msra.mxu1 %v594_v49  ;;  %565 = vmatprep.subr.bf16.mxu0 %v564_v50  ;;  %p702_p13 = por %p701_p12, %p700_p11 }
  0x5d   :  { %597 = vmatprep.subr.bf16.mxu1 %v596_v54 }
  0x5e   :  { %p703_p0 = pnand %p702_p13, %p696_p10 }
  0x5f   :  { %567 = vmatpush1.bf16.msra.mxu0 %v566_v60 }
  0x60   :  { %599 = vmatpush1.bf16.msra.mxu1 %v598_v61  ;;  %569 = vmatprep.subr.bf16.mxu0 %v568_v62 }
  0x61   :  { %601 = vmatprep.subr.bf16.mxu1 %v600_v3 }
  0x63   :  { %571 = vmatpush1.bf16.msra.mxu0 %v570_v9 }
  0x64   :  { %603 = vmatpush1.bf16.msra.mxu1 %v602_v10  ;;  %573 = vmatprep.subr.bf16.mxu0 %v572_v11 }
  0x65   :  { %605 = vmatprep.subr.bf16.mxu1 %v604_v14 }
  0x67   :  { %575 = vmatpush1.bf16.msra.mxu0 %v574_v17 }
  0x68   :  { %607 = vmatpush1.bf16.msra.mxu1 %v606_v18 }
  0x6a   :  { %369 = vmatmul.mubr.f32.vlgmr.msra.gmra.mrb[0].mxu0 %v60_v19 }
  0x6b   :  { %440 = vmatmul.mubr.f32.vlgmr.msra.gmra.mrb[0].mxu1 %v60_v19 }
 0x13d   :  { %v370_v26 = vpop.f32.mrb[0].mxu0 }
 0x13e   :  { %v468_v28 = vadd.f32 %v451_v25, %v370_v26  ;;  %v441_v29 = vpop.f32.mrb[0].mxu1  ;;  %v372_v30 = vpop.f32.mrb[1].mxu0 }
 0x13f   :  { %v443_v31 = vpop.f32.mrb[1].mxu1  ;;  %v469_v33 = vadd.f32 %v455_v27, %v372_v30  ;;  %v470_v44 = vadd.f32 %v459_v40, %v441_v29 }
 0x140   :  { %v510_v32 = vmul.f32 -1.442695, %v468_v28  ;;  %v471_v42 = vadd.f32 %v463_v39, %v443_v31 }
 0x141   :  { %v511_v34 = vmul.f32 -1.442695, %v469_v33 }
 0x142   :  { %619 = vpow2.f32 %v510_v32 }
 0x143   :  { %621 = vpow2.f32 %v511_v34 }
 0x14c   :  { %v620_v35 = vpop.eup %619 }
 0x14d   :  { %v475_v36 = vadd.f32 1.0, %v620_v35  ;;  %v622_v38 = vpop.eup %621 }
 0x14e   :  { %v481_v41 = vadd.f32 1.0, %v622_v38 }
 0x14f   :  { %623 = vrcp.f32 %v475_v36 }
 0x150   :  { %625 = vrcp.f32 %v481_v41 }
 0x159   :  { %v624_v43 = vpop.eup %623 }
 0x15a   :  { %v484_v45 = vmul.f32 %v624_v43, %v471_v42  ;;  %v626_v47 = vpop.eup %625 }
 0x15b   :  { %v487_v48 = vsub.f32 1.0, %v626_v47  ;;  %v489_v51 = vmul.f32 %v626_v47, %v60_v19 }
 0x15c   :  { %v485_v46 = vadd.f32 %v484_v45, %v470_v44 }
 0x15e   :  { %627 = vtanh.f32 %v485_v46 }
 0x168   :  { %v628_v49 = vpop.eup %627 }
 0x169   :  { %v488_v50 = vmul.f32 %v628_v49, %v487_v48 }
 0x16b   :  { %v490_v52 = vadd.f32 %v489_v51, %v488_v50 }
 0x16d   :  { %491 = vst [vmem:[#allocation8] sm:$0x3] %v490_v52 }
 0x16e   :  { %706 = shalt.err (!%p703_p0)
}
 0x16f   :  { %s707_s10 = scalar_lea.hbm %s831_s5, 32 }
 0x170   :  { %p708_p1 = scmp.ne.s32.totalorder %s831_s5, %s707_s10  ;;  %p711_p2 = scmp.lt.u32.totalorder %s707_s10, %s831_s5 }
 0x172   :  { %p713_p3 = pnand %p711_p2, %p708_p1 }
 0x174   :  { %716 = shalt.err (!%p713_p3)
}
 0x175   :  { %501 = dma.vmem_to_hbm [thread:$0]  %s499_s6, 32, %s831_s5, [#allocation4]  }
 0x176   :  { %721 = dma.done.wait [#allocation4], 32  }
 0x177   :  { %722 = vsyncadd [#allocation4], 4294967264 }
 0x178   :  { %505 = vsyncpa [#allocation3], 1 }
 0x179   :  { %506 = vsyncpa [#allocation6], 1 }
 0x17a   :  { %507 = vsyncpa [#allocation4], 1 }

</bundles_post_ra>
